<compile_context>
chip_gen: v6e
topology: v6e:2x2x1
jax: 0.10.0
libtpu: 0.0.40
codegen_flags: <defaults>
</compile_context>

<pallas_src>
import jax
import jax.numpy as jnp
from jax.experimental import pallas as pl
from jax.experimental.pallas import tpu as pltpu

LANE = 128                       # lane-dense padded width for all feature dims
VMEM_LIMIT = 48 * 1024 * 1024    # explicit scoped-VMEM budget (headroom on v7x 64 MiB)


def _round_up(n, m):
    return ((n + m - 1) // m) * m


def _pad2d(x, rows, cols, dtype=None):
    out = jnp.pad(x, ((0, rows - x.shape[0]), (0, cols - x.shape[1])))
    return out.astype(dtype) if dtype is not None else out


# ----------------------------------------------------------------------------
# Kernel 1: one GCN layer, tiled over (row blocks, node-reduction blocks).
#   h_out[i, :] = relu( sum_k a[i, k] @ (h[k] @ W) + b )
# ----------------------------------------------------------------------------
def gcn_layer_kernel(a_ref, h_ref, w_ref, b_ref, out_ref, acc_ref):
    k = pl.program_id(1)

    @pl.when(k == 0)
    def _():
        acc_ref[...] = jnp.zeros_like(acc_ref)

    # Tiny lane-dense projection fused into the reduction pass (bf16 MXU,
    # f32 accumulation), then bf16 propagation against the a_hat tile.
    proj = jnp.dot(h_ref[...], w_ref[...], preferred_element_type=jnp.float32)
    acc_ref[...] += jnp.dot(a_ref[...], proj.astype(jnp.bfloat16),
                            preferred_element_type=jnp.float32)

    @pl.when(k == pl.num_programs(1) - 1)
    def _():
        # bias-add + ReLU in f32, cast once on store.
        out_ref[...] = jnp.maximum(acc_ref[...] + b_ref[...], 0.0
                                   ).astype(out_ref.dtype)


def gcn_layer(a_pad, h_pad, w_pad, b_pad, *, tile_m, tile_k):
    n_pad = a_pad.shape[0]
    grid = (n_pad // tile_m, n_pad // tile_k)
    return pl.pallas_call(
        gcn_layer_kernel,
        out_shape=jax.ShapeDtypeStruct((n_pad, LANE), jnp.bfloat16),
        grid_spec=pltpu.PrefetchScalarGridSpec(
            num_scalar_prefetch=0,
            grid=grid,
            in_specs=[
                pl.BlockSpec((tile_m, tile_k), lambda i, k: (i, k)),   # a_hat tile
                pl.BlockSpec((tile_k, LANE), lambda i, k: (k, 0)),     # h tile
                pl.BlockSpec((LANE, LANE), lambda i, k: (0, 0)),       # W (full)
                pl.BlockSpec((1, LANE), lambda i, k: (0, 0)),          # b (full)
            ],
            out_specs=pl.BlockSpec((tile_m, LANE), lambda i, k: (i, 0)),
            scratch_shapes=[pltpu.VMEM((tile_m, LANE), jnp.float32)],
        ),
        compiler_params=pltpu.CompilerParams(
            dimension_semantics=("parallel", "arbitrary"),
            vmem_limit_bytes=VMEM_LIMIT,
        ),
    )(a_pad, h_pad, w_pad, b_pad)


# ----------------------------------------------------------------------------
# Kernel 2: global_mean_pool + fc + sigmoid, tiled over node-reduction blocks.
#   out = sigmoid( (pool @ h3) @ Wf + bf )   (lane-padded to [G, 128])
# ----------------------------------------------------------------------------
def pool_fc_kernel(p_ref, h_ref, wf_ref, bf_ref, out_ref, acc_ref):
    k = pl.program_id(0)

    @pl.when(k == 0)
    def _():
        acc_ref[...] = jnp.zeros_like(acc_ref)

    acc_ref[...] += jnp.dot(p_ref[...], h_ref[...],
                            preferred_element_type=jnp.float32)

    @pl.when(k == pl.num_programs(0) - 1)
    def _():
        y = jnp.dot(acc_ref[...].astype(jnp.bfloat16), wf_ref[...],
                    preferred_element_type=jnp.float32) + bf_ref[...]
        out_ref[...] = jax.nn.sigmoid(y)


def pool_fc(pool_pad, h_pad, wf_pad, bf_pad, *, tile_k):
    g = pool_pad.shape[0]
    n_pad = h_pad.shape[0]
    grid = (n_pad // tile_k,)
    return pl.pallas_call(
        pool_fc_kernel,
        out_shape=jax.ShapeDtypeStruct((g, LANE), jnp.float32),
        grid_spec=pltpu.PrefetchScalarGridSpec(
            num_scalar_prefetch=0,
            grid=grid,
            in_specs=[
                pl.BlockSpec((g, tile_k), lambda k: (0, k)),       # pool tile
                pl.BlockSpec((tile_k, LANE), lambda k: (k, 0)),    # h3 tile
                pl.BlockSpec((LANE, LANE), lambda k: (0, 0)),      # Wf (full)
                pl.BlockSpec((1, LANE), lambda k: (0, 0)),         # bf (full)
            ],
            out_specs=pl.BlockSpec((g, LANE), lambda k: (0, 0)),
            scratch_shapes=[pltpu.VMEM((g, LANE), jnp.float32)],
        ),
        compiler_params=pltpu.CompilerParams(
            dimension_semantics=("arbitrary",),
            vmem_limit_bytes=VMEM_LIMIT,
        ),
    )(pool_pad, h_pad, wf_pad, bf_pad)


# ----------------------------------------------------------------------------
# Forward wrapper: pad to lane-dense / tile-aligned shapes, cast the large
# operands (a_hat, h, pool) and weights to bf16, run the tiled kernels.
# ----------------------------------------------------------------------------
def degradability_gnn_forward(a_hat, pool, x, params, *, tile_m=128, tile_k=128):
    (w1, b1, w2, b2, w3, b3, wf, bf) = params
    num_nodes = x.shape[0]
    num_graphs = pool.shape[0]
    n_pad = _round_up(num_nodes, max(tile_m, tile_k))

    # Zero-padding is exact: padded adjacency rows/cols are zero and padded
    # pool columns are zero, so padded "nodes" never influence real outputs.
    a_pad = _pad2d(a_hat, n_pad, n_pad, jnp.bfloat16)
    p_pad = _pad2d(pool, num_graphs, n_pad, jnp.bfloat16)
    h = _pad2d(x, n_pad, LANE, jnp.bfloat16)

    for w, b in ((w1, b1), (w2, b2), (w3, b3)):
        w_pad = _pad2d(w, LANE, LANE, jnp.bfloat16)
        b_pad = _pad2d(b, 1, LANE, jnp.float32)
        h = gcn_layer(a_pad, h, w_pad, b_pad, tile_m=tile_m, tile_k=tile_k)

    wf_pad = _pad2d(wf, LANE, LANE, jnp.bfloat16)
    bf_pad = _pad2d(bf, 1, LANE, jnp.float32)
    y = pool_fc(p_pad, h, wf_pad, bf_pad, tile_k=tile_k)   # [G, 128] lane-padded
    return y[:, :1]                                          # [G, 1]


# ----------------------------------------------------------------------------
# Plain-JAX glue: dense normalized adjacency, pooling matrix, params, reference
# ----------------------------------------------------------------------------
def build_gcn_adjacency(edge_index, num_nodes):
    """Dense D^{-1/2} (A + I) D^{-1/2} as used by GCNConv (add_self_loops=True).

    Note: assumes edge_index has no duplicates and no pre-existing self loops
    (true for the synthetic graphs below), matching PyG GCNConv semantics.
    """
    src, dst = edge_index[0], edge_index[1]
    adj = jnp.zeros((num_nodes, num_nodes), jnp.float32)
    adj = adj.at[dst, src].set(1.0)                 # row = target, col = source
    adj = adj + jnp.eye(num_nodes, dtype=jnp.float32)
    deg = adj.sum(axis=1)
    d_inv_sqrt = jnp.where(deg > 0, 1.0 / jnp.sqrt(deg), 0.0)
    return d_inv_sqrt[:, None] * adj * d_inv_sqrt[None, :]


def build_pool_matrix(batch, num_graphs, num_nodes):
    """pool[g, n] = 1/count(g) if batch[n] == g else 0  (global_mean_pool)."""
    one_hot = (batch[None, :] == jnp.arange(num_graphs)[:, None]).astype(jnp.float32)
    counts = one_hot.sum(axis=1, keepdims=True)
    return one_hot / jnp.maximum(counts, 1.0)


def init_params(key, num_node_features):
    """Deterministic synthetic params (shapes from DegradabilityGNN.__init__)."""
    ks = jax.random.split(key, 4)
    def w(k, fan_in, fan_out):
        return (jax.random.normal(k, (fan_in, fan_out), jnp.float32)
                / jnp.sqrt(jnp.float32(fan_in)))
    w1 = w(ks[0], num_node_features, 64); b1 = jnp.zeros((1, 64), jnp.float32)
    w2 = w(ks[1], 64, 32);                b2 = jnp.zeros((1, 32), jnp.float32)
    w3 = w(ks[2], 32, 16);                b3 = jnp.zeros((1, 16), jnp.float32)
    wf = w(ks[3], 16, 1);                 bf = 0.01 * jnp.ones((1, 1), jnp.float32)
    return (w1, b1, w2, b2, w3, b3, wf, bf)


def reference_forward(a_hat, pool, x, params):
    """Pure-JAX f32 reference (matches the PyTorch module semantics)."""
    (w1, b1, w2, b2, w3, b3, wf, bf) = params
    h = jnp.maximum(a_hat @ (x @ w1) + b1, 0.0)
    h = jnp.maximum(a_hat @ (h @ w2) + b2, 0.0)
    h = jnp.maximum(a_hat @ (h @ w3) + b3, 0.0)
    g = pool @ h
    return jax.nn.sigmoid(g @ wf + bf)


# ----------------------------------------------------------------------------
if __name__ == "__main__":
    key = jax.random.PRNGKey(0)
    num_node_features = 8
    nodes_per_graph = 80
    num_graphs = 2
    num_nodes = nodes_per_graph * num_graphs      # 160 -> pads to 256, grid (2, 2)

    k_x, k_p = jax.random.split(key)

    # node features
    x = jax.random.normal(k_x, (num_nodes, num_node_features), jnp.float32)

    # batch vector: first 80 nodes -> graph 0, next 80 -> graph 1
    batch = jnp.concatenate([jnp.full(nodes_per_graph, 0, jnp.int32),
                             jnp.full(nodes_per_graph, 1, jnp.int32)])

    # edge_index: undirected ring within each graph (2, E)
    def ring_edges(offset, n):
        s = jnp.arange(n) + offset
        d = (jnp.arange(n) + 1) % n + offset
        fwd = jnp.stack([s, d])
        bwd = jnp.stack([d, s])
        return jnp.concatenate([fwd, bwd], axis=1)

    edge_index = jnp.concatenate(
        [ring_edges(0, nodes_per_graph),
         ring_edges(nodes_per_graph, nodes_per_graph)], axis=1).astype(jnp.int32)

    a_hat = build_gcn_adjacency(edge_index, num_nodes)            # (160, 160)
    pool = build_pool_matrix(batch, num_graphs, num_nodes)        # (2, 160)
    params = init_params(k_p, num_node_features)

    out = degradability_gnn_forward(a_hat, pool, x, params,
                                    tile_m=128, tile_k=128)
    out = jax.block_until_ready(out)

    ref = reference_forward(a_hat, pool, x, params)

    assert out.shape == (num_graphs, 1)
    assert bool(jnp.all((out >= 0.0) & (out <= 1.0)))
    # bf16 propagation with f32 accumulation: loose tolerance vs f32 reference
    assert bool(jnp.max(jnp.abs(out - ref)) < 5e-2)
    print("KERNEL_OK")
</pallas_src>

<mosaic_0001>
module attributes {stable_mosaic.version = 11 : i64} {
  func.func @gcn_layer_kernel(%arg0: i32, %arg1: i32, %arg2: memref<128x128xbf16, #tpu.memory_space<vmem>>, %arg3: memref<128x128xbf16, #tpu.memory_space<vmem>>, %arg4: memref<128x128xbf16, #tpu.memory_space<vmem>>, %arg5: memref<1x128xf32, #tpu.memory_space<vmem>>, %arg6: memref<128x128xbf16, #tpu.memory_space<vmem>>, %arg7: memref<128x128xf32, #tpu.memory_space<vmem>>) attributes {dimension_semantics = [#tpu.dimension_semantics<parallel>, #tpu.dimension_semantics<arbitrary>], iteration_bounds = array<i64: 2, 2>, scalar_prefetch = 0 : i64, scratch_operands = 1 : i64, tpu.core_type = #tpu.core_type<tc>, window_params = [{transform_indices = @transform_0, window_bounds = array<i64: 128, 128>}, {transform_indices = @transform_1, window_bounds = array<i64: 128, 128>}, {pipeline_mode = #tpu.pipeline_mode<synchronous>, transform_indices = @transform_2, window_bounds = array<i64: 128, 128>}, {pipeline_mode = #tpu.pipeline_mode<synchronous>, transform_indices = @transform_3, window_bounds = array<i64: 1, 128>}, {transform_indices = @transform_4, window_bounds = array<i64: 128, 128>}]} {
    %c0_i32 = arith.constant 0 : i32
    %0 = arith.cmpi eq, %arg1, %c0_i32 : i32
    %1 = arith.extui %0 : i1 to i32
    %c0_i32_0 = arith.constant 0 : i32
    %2 = arith.cmpi ne, %1, %c0_i32_0 : i32
    scf.if %2 {
      %cst_12 = arith.constant 0.000000e+00 : f32
      %15 = vector.broadcast %cst_12 : f32 to vector<128x128xf32>
      %c0_13 = arith.constant 0 : index
      %c0_14 = arith.constant 0 : index
      %16 = vector.load %arg7[%c0_13, %c0_14] : memref<128x128xf32, #tpu.memory_space<vmem>>, vector<128x128xf32>
      tpu.vector_store %arg7[%c0_13, %c0_14], %15 {strides = array<i32>} : memref<128x128xf32, #tpu.memory_space<vmem>>, vector<128x128xf32>,
    } else {
    }
    %c0 = arith.constant 0 : index
    %c0_1 = arith.constant 0 : index
    %3 = vector.load %arg3[%c0, %c0_1] : memref<128x128xbf16, #tpu.memory_space<vmem>>, vector<128x128xbf16>
    %c0_2 = arith.constant 0 : index
    %c0_3 = arith.constant 0 : index
    %4 = vector.load %arg4[%c0_2, %c0_3] : memref<128x128xbf16, #tpu.memory_space<vmem>>, vector<128x128xbf16>
    %cst = arith.constant dense<0.000000e+00> : vector<128x128xf32>
    %5 = tpu.matmul %3, %4, %cst {dimension_numbers = #tpu.dot_dimension_numbers<[1], [0], [0], [1], [0, 0, 1, 1], [], []>} : vector<128x128xbf16>, vector<128x128xbf16>, vector<128x128xf32> -> vector<128x128xf32>
    %c0_4 = arith.constant 0 : index
    %c0_5 = arith.constant 0 : index
    %6 = vector.load %arg7[%c0_4, %c0_5] : memref<128x128xf32, #tpu.memory_space<vmem>>, vector<128x128xf32>
    %c0_6 = arith.constant 0 : index
    %c0_7 = arith.constant 0 : index
    %7 = vector.load %arg2[%c0_6, %c0_7] : memref<128x128xbf16, #tpu.memory_space<vmem>>, vector<128x128xbf16>
    %8 = arith.truncf %5 : vector<128x128xf32> to vector<128x128xbf16>
    %cst_8 = arith.constant dense<0.000000e+00> : vector<128x128xf32>
    %9 = tpu.matmul %7, %8, %cst_8 {dimension_numbers = #tpu.dot_dimension_numbers<[1], [0], [0], [1], [0, 0, 1, 1], [], []>} : vector<128x128xbf16>, vector<128x128xbf16>, vector<128x128xf32> -> vector<128x128xf32>
    %10 = arith.addf %6, %9 : vector<128x128xf32>
    %c0_9 = arith.constant 0 : index
    %c0_10 = arith.constant 0 : index
    %11 = vector.load %arg7[%c0_9, %c0_10] : memref<128x128xf32, #tpu.memory_space<vmem>>, vector<128x128xf32>
    tpu.vector_store %arg7[%c0_9, %c0_10], %10 {strides = array<i32>} : memref<128x128xf32, #tpu.memory_space<vmem>>, vector<128x128xf32>,
    %c1_i32 = arith.constant 1 : i32
    %12 = arith.cmpi eq, %arg1, %c1_i32 : i32
    %13 = arith.extui %12 : i1 to i32
    %c0_i32_11 = arith.constant 0 : i32
    %14 = arith.cmpi ne, %13, %c0_i32_11 : i32
    scf.if %14 {
      %c0_12 = arith.constant 0 : index
      %c0_13 = arith.constant 0 : index
      %15 = vector.load %arg7[%c0_12, %c0_13] : memref<128x128xf32, #tpu.memory_space<vmem>>, vector<128x128xf32>
      %c0_14 = arith.constant 0 : index
      %c0_15 = arith.constant 0 : index
      %16 = vector.load %arg5[%c0_14, %c0_15] : memref<1x128xf32, #tpu.memory_space<vmem>>, vector<1x128xf32>
      %17 = vector.broadcast %16 : vector<1x128xf32> to vector<128x128xf32>
      %18 = arith.addf %15, %17 : vector<128x128xf32>
      %cst_16 = arith.constant 0.000000e+00 : f32
      %19 = vector.broadcast %cst_16 : f32 to vector<128x128xf32>
      %20 = arith.maximumf %18, %19 : vector<128x128xf32>
      %21 = arith.truncf %20 : vector<128x128xf32> to vector<128x128xbf16>
      %c0_17 = arith.constant 0 : index
      %c0_18 = arith.constant 0 : index
      %22 = vector.load %arg6[%c0_17, %c0_18] : memref<128x128xbf16, #tpu.memory_space<vmem>>, vector<128x128xbf16>
      tpu.vector_store %arg6[%c0_17, %c0_18], %21 {strides = array<i32>} : memref<128x128xbf16, #tpu.memory_space<vmem>>, vector<128x128xbf16>,
    } else {
    }
    return
  }
  func.func @transform_0(%arg0: i32, %arg1: i32) -> (i32, i32) {
    %c0_i32 = arith.constant 0 : i32
    return %arg0, %arg1 : i32, i32
  }
  func.func @transform_1(%arg0: i32, %arg1: i32) -> (i32, i32) {
    %c0_i32 = arith.constant 0 : i32
    %c0_i32_0 = arith.constant 0 : i32
    return %arg1, %c0_i32 : i32, i32
  }
  func.func @transform_2(%arg0: i32, %arg1: i32) -> (i32, i32) {
    %c0_i32 = arith.constant 0 : i32
    %c0_i32_0 = arith.constant 0 : i32
    %c0_i32_1 = arith.constant 0 : i32
    return %c0_i32, %c0_i32_0 : i32, i32
  }
  func.func @transform_3(%arg0: i32, %arg1: i32) -> (i32, i32) {
    %c0_i32 = arith.constant 0 : i32
    %c0_i32_0 = arith.constant 0 : i32
    %c0_i32_1 = arith.constant 0 : i32
    return %c0_i32, %c0_i32_0 : i32, i32
  }
  func.func @transform_4(%arg0: i32, %arg1: i32) -> (i32, i32) {
    %c0_i32 = arith.constant 0 : i32
    %c0_i32_0 = arith.constant 0 : i32
    return %arg0, %c0_i32 : i32, i32
  }
}

</mosaic_0001>

<bundles_post_ra>
// kernel: tpu_custom_call.1
= control target key start
LH: loop header
LB: loop body
LE: loop exit
PB: predicated region body
PF: predicated region fallthrough
CT: control target
= control target key end

     0   :  { %s2034_s0 = inlined_call_operand.hbm [shape: bf16[256,256], index: 0, kind: input, shape index: {}]   ;;  %s2035_s1 = inlined_call_operand.hbm [shape: bf16[256,128], index: 1, kind: input, shape index: {}]   ;;  %s2036_s2 = inlined_call_operand.hbm [shape: bf16[128,128], index: 2, kind: input, shape index: {}]   ;;  %s2037_s3 = inlined_call_operand.vmem [shape: f32[1,128], index: 3, kind: input, shape index: {}]   ;;  %s2038_s4 = inlined_call_operand.hbm [shape: bf16[256,128], index: 4, kind: output, shape index: {}]  }
   0x1   :  { %2058 = sst [smem:[#allocation23_spill]] %s2036_s2 }
   0x2   :  { %2059 = sst [smem:[#allocation24_spill]] %s2037_s3 }
   0x3   :  { %2060 = sst [smem:[#allocation25_spill]] %s2038_s4 }
   0x4   :  { %9 = vsyncpa [#allocation4], 0 }
   0x5   :  { %11 = vsyncpa [#allocation4 + $0x1], 0 }
   0x6   :  { %12 = vsyncpa [#allocation7], 0 }
   0x7   :  { %14 = vsyncpa [#allocation7 + $0x1], 0 }
   0x8   :  { %15 = vsyncpa [#allocation5], 0 }
   0x9   :  { %17 = vsyncpa [#allocation5 + $0x1], 0  ;;  %s1693_s15 = smov 0   ;;  %s1695_s16 = smov 0  }
   0xa   :  { %s1697_s17 = smov 0   ;;  %s1699_s18 = smov 0  }
   0xb   :  { %s1701_s19 = smov 0   ;;  %s1703_s20 = smov 0  }
   0xc   :  { %s1705_s21 = smov 0   ;;  %s1707_s22 = smov 0  }
   0xd   :  { %s1709_s23 = smov 0   ;;  %s1711_s24 = smov 0  }
   0xe   :  { %s1713_s25 = smov 0   ;;  %s1715_s26 = smov 0  }
   0xf   :  { %s1717_s27 = smov 0   ;;  %s1719_s28 = smov 0  }
  0x10 LB: > { %2061 = sst [smem:[#allocation14_spill]] %s1604_s15  ;;  %s1760_s29 = sadd.s32 4294967295, %s1656_s28   ;;  %s1656_s28 = sphi %s1719_s28, %s23_s28   ;;  %s1652_s27 = sphi %s1717_s27, %s2116_s27   ;;  %s1648_s26 = sphi %s1715_s26, %s2115_s26   ;;  %s1644_s25 = sphi %s1713_s25, %s2114_s25   ;;  %s1640_s24 = sphi %s1711_s24, %s2113_s24   ;;  %s1636_s23 = sphi %s1709_s23, %s2112_s23   ;;  %s1632_s22 = sphi %s1707_s22, %s2111_s22   ;;  %s1628_s21 = sphi %s1705_s21, %s2110_s21   ;;  %s1624_s20 = sphi %s1703_s20, %s2109_s20   ;;  %s1620_s19 = sphi %s1701_s19, %s2108_s19   ;;  %s1616_s18 = sphi %s1699_s18, %s2107_s18   ;;  %s1612_s17 = sphi %s1697_s17, %s2106_s17   ;;  %s1608_s16 = sphi %s1695_s16, %s2105_s16   ;;  %s1604_s15 = sphi %s1693_s15, %s2104_s15  }
  0x11   : > { %2062 = sst [smem:[#allocation15_spill]] %s1608_s16  ;;  %s1024_s30 = sadd.s32 4294967294, %s1656_s28  }
  0x12   : > { %2063 = sst [smem:[#allocation16_spill]] %s1640_s24  ;;  %p57_p0 = scmp.ne.s32.totalorder %s1632_s22, %s1628_s21 }
  0x13   : > { %2064 = sst [smem:[#allocation17_spill]] %s1644_s25  ;;  %p2057_p1 = scmp.eq.s32.totalorder %s1760_s29, 0 }
  0x14   : > { %2065 = sst [smem:[#allocation18_spill]] %s1760_s29  ;;  %p83_p2 = scmp.ne.s32.totalorder %s1620_s19, %s1616_s18 }
  0x15   : > { %p1769_p3 = por %p2057_p1, %p57_p0  ;;  %p148_p4 = scmp.ne.s32.totalorder %s1612_s17, %s1608_s16 }
  0x16   : > { %p1777_p5 = por %p83_p2, %p2057_p1  ;;  %p149_p6 = scmp.eq.s32.totalorder %s1760_s29, 3 }
  0x17   : > { %p154_p7 = scmp.ne.s32.totalorder %s1608_s16, %s1604_s15  ;;  %p155_p8 = scmp.eq.s32.totalorder %s1024_s30, 3 }
  0x18   : > { %s2067_s7 = scalar_select %p1777_p5, 1, 0 }
  0x19   : > { %p1784_p9 = por %p149_p6, %p148_p4  ;;  %p1025_p10 = scmp.ge.s32.totalorder %s1656_s28, 1 }
  0x1a   : > { %2068 = sst [smem:[#allocation19_spill]] %s2067_s7  ;;  %p1789_p11 = por %p155_p8, %p154_p7 }
  0x1b   : > { %s2069_s8 = scalar_select %p1784_p9, 1, 0 }
  0x1c   : > { %s2071_s9 = scalar_select %p1789_p11, 1, 0 }
  0x1d   : > { %2070 = sst [smem:[#allocation20_spill]] %s2069_s8  ;;  %p162_p12 = scmp.lt.s32.totalorder %s1656_s28, 5 }
  0x1e   : > { %2072 = sst [smem:[#allocation21_spill]] %s2071_s9  ;;  %s1658_s11 = smov [#allocation8]  }
  0x1f   : > { %p1794_p13 = pnand %p1025_p10, %p162_p12  ;;  %s174_s12 = sshll.u32 %s1658_s11, 4  ;;  %s175_s12 = int_to_ptr.vmem [resolvable:$true] %s174_s12 }
  0x20   : > { %s1433_s13 = scalar_lea.vmem %s175_s12, 1024  ;;  %p1441_p9 = scmp.lt.s32.totalorder %s175_s12, %s175_s12 }
  0x21   : > { %p1260_p0 = pneg %p1794_p13  ;;  %p1434_p6 = scmp.ne.s32.totalorder %s175_s12, %s1433_s13 }
  0x22   : > { %p1442_p11 = scmp.lt.s32.totalorder %s1433_s13, %s1433_s13 }
  0x23   : > { %p1261_p2 = pnand %p1260_p0, %p2057_p1 }
  0x24   : > { %p1443_p5 = por %p1442_p11, %p1441_p9 }
  0x25   : > { %p1424_p4 = pneg %p1261_p2 }
  0x27   : > { %p1436_p7 = pnand %p1434_p6, %p1424_p4 }
  0x29   : > { %p1437_p8 = pneg %p1436_p7 }
  0x2b   : > { %p1444_p10 = pnand %p1443_p5, %p1437_p8 }
  0x2d   : > { %1447 = shalt.err (!%p1444_p10)
}
  0x2e   : > { %s2042_s14 = smov 64   ;;  %s2044_s18 = smov 4  }
  0x2f   : > { %s2074_s2 = sld [smem:[#allocation23_spill]]  ;;  %s32_s11 = sadd.s32 1, %s1648_s26 }
  0x30   : > { %p33_p5 = scmp.ge.s32.totalorder %s32_s11, 2  ;;  %s35_s13 = sadd.s32 1, %s1652_s27 }
  0x31   : > { %s44_s5 = sadd.s32 1, %s1636_s23  ;;  %p51_p9 = scmp.ne.s32.totalorder %s1636_s23, %s1632_s22 }
  0x32   : > { %s2118_s11 = smov (%p33_p5, %s32_s11), 0  ;;  %s2120_s13 = smov (!%p33_p5, %s35_s13), %s1652_s27 }
  0x33   : > { %2075 = sst [smem:[#allocation22_spill]] %s2118_s11  ;;  %s1818_s9 = ssub.s32 %s1648_s26, %s2118_s11 }
  0x34   : > { %p52_p11 = scmp.eq.s32.totalorder %s1656_s28, 0  ;;  %p37_p12 = scmp.ge.s32.totalorder %s2120_s13, 2 }
  0x35   : > { %1263 = dma.hbm_to_vmem [thread:$0]  (!%p1261_p2), %s2074_s2, 1024, %s175_s12, [#allocation7], %s2042_s14, %s2042_s14, %s2044_s18  }
  0x36   : > { %p68_p0 = scmp.eq.s32.totalorder %s1818_s9, 0  ;;  %p1824_p2 = por %p52_p11, %p51_p9 }
  0x37   : > { %p1276_p4 = scmp.lt.s32.totalorder %s1656_s28, 4  ;;  %s2122_s13 = smov (%p37_p12, %s2120_s13), 0 }
  0x38   : > { %s191_s21 = sand.u32 1, %s1636_s23   ;;  %s1088_s30 = sshll.u32 %s1652_s27, 5 }
  0x39   : > { %s39_s14 = ssub.s32 %s1652_s27, %s2122_s13  ;;  %s1028_s2 = sshll.u32 %s191_s21, 6 }
  0x3a   : > { %s41_s18 = sor.u32 %s1818_s9, %s39_s14  ;;  %p136_p6 = scmp.eq.s32.totalorder %s39_s14, 0 }
  0x3b   : > { %p42_p7 = scmp.eq.s32.totalorder %s41_s18, 0  ;;  %s2077_s11 = sadd.s32 1, %s1612_s17 }
  0x3c   : > { %s1839_s15 = scalar_select %p136_p6, %s1612_s17, %s2077_s11  }
  0x3d   : > { %s1842_s4 = scalar_select %p42_p7, %s1636_s23, %s44_s5  }
  0x3e   : > { %s201_s8 = sadd.s32 %s1648_s26, %s1088_s30  ;;  %s195_s3 = scalar_lea.vmem [#allocation3], %s1028_s2 }
  0x3f   : > { %s1031_s25 = sshll.u32 %s201_s8, 6  ;;  %s204_s24 = sshll.u32 %s195_s3, 4  ;;  %s205_s24 = int_to_ptr.vmem [resolvable:$true] %s204_s24 }
  0x40   : > { %s203_s29 = scalar_lea.hbm %s2034_s0, %s1031_s25  ;;  %p1852_p8 = pnand %p1276_p4, %p1824_p2 }
  0x41   : > { %s192_s11 = scalar_lea.sflag [#allocation4], %s191_s21  ;;  %s1461_s5 = scalar_lea.vmem %s205_s24, 1024 }
  0x42   : > { %p1450_p10 = pneg %p1852_p8  ;;  %p1462_p5 = scmp.ne.s32.totalorder %s205_s24, %s1461_s5 }
  0x43   : > { %s1661_s2 = smov [#allocation3]  }
  0x44   : > { %p1464_p9 = pnand %p1462_p5, %p1450_p10  ;;  %s1466_s3 = sshll.u32 %s1661_s2, 4  ;;  %s1467_s3 = int_to_ptr.vmem [resolvable:$false] %s1466_s3 }
  0x45   : > { %s1468_s16 = scalar_lea.vmem %s1467_s3, 2048  ;;  %p1469_p6 = scmp.lt.s32.totalorder %s205_s24, %s1467_s3 }
  0x46   : > { %p1465_p12 = pneg %p1464_p9  ;;  %p1470_p7 = scmp.lt.s32.totalorder %s1468_s16, %s1461_s5 }
  0x48   : > { %p1471_p1 = por %p1470_p7, %p1469_p6 }
  0x4a   : > { %p1472_p2 = pnand %p1471_p1, %p1465_p12 }
  0x4c   : > { %1475 = shalt.err (!%p1472_p2)
}
  0x4d   : > { %s1662_s25 = smov 128   ;;  %s2079_s7 = smov 4  }
  0x4e   : > { %s2080_s8 = smov 64   ;;  %s70_s12 = sadd.s32 1, %s1624_s20 }
  0x4f   : > { %1267 = dma.hbm_to_vmem [thread:$0]  (!%p1852_p8), %s203_s29, 1024, %s205_s24, %s192_s11, %s1662_s25, %s2080_s8, %s2079_s7  }
  0x50   : > { %p77_p10 = scmp.ne.s32.totalorder %s1624_s20, %s1620_s19  ;;  %s216_s30 = sand.u32 1, %s1624_s20  }
  0x51   : > { %s1869_s21 = scalar_select %p68_p0, %s1624_s20, %s70_s12  }
  0x52   : > { %p79_p1 = por %p77_p10, %p52_p11  ;;  %s1089_s14 = sshll.u32 %s1648_s26, 10 }
  0x53   : > { %s1032_s5 = sshll.u32 %s216_s30, 6  ;;  %s224_s16 = scalar_lea.hbm %s2035_s1, %s1089_s14 }
  0x54   : > { %p1880_p5 = pnand %p1276_p4, %p79_p1  ;;  %s218_s24 = scalar_lea.vmem [#allocation6], %s1032_s5 }
  0x55   : > { %s225_s29 = sshll.u32 %s218_s24, 4  ;;  %s2082_s9 = sand.u32 1, %s1656_s28   ;;  %s226_s29 = int_to_ptr.vmem [resolvable:$true] %s225_s29 }
  0x56   : > { %s215_s11 = scalar_lea.sflag [#allocation7], %s2082_s9  ;;  %p1478_p11 = pneg %p1880_p5 }
  0x57   : > { %s1489_s25 = scalar_lea.vmem %s226_s29, 1024  ;;  %s1663_s12 = smov [#allocation6]  }
  0x58   : > { %p1490_p0 = scmp.ne.s32.totalorder %s226_s29, %s1489_s25  ;;  %s1494_s30 = sshll.u32 %s1663_s12, 4  ;;  %s1495_s30 = int_to_ptr.vmem [resolvable:$false] %s1494_s30 }
  0x59   : > { %s1496_s14 = scalar_lea.vmem %s1495_s30, 2048  ;;  %p1497_p4 = scmp.lt.s32.totalorder %s226_s29, %s1495_s30 }
  0x5a   : > { %p1492_p8 = pnand %p1490_p0, %p1478_p11  ;;  %p1498_p12 = scmp.lt.s32.totalorder %s1496_s14, %s1489_s25 }
  0x5c   : > { %p1493_p9 = pneg %p1492_p8  ;;  %p1499_p6 = por %p1498_p12, %p1497_p4 }
  0x5e   : > { %p1500_p7 = pnand %p1499_p6, %p1493_p9 }
  0x60   : > { %1503 = shalt.err (!%p1500_p7)
}
  0x61   : > { %1270 = dma.hbm_to_vmem [thread:$0]  (!%p1880_p5), %s224_s16, 1024, %s226_s29, %s215_s11, %s2080_s8, %s2080_s8, %s2079_s7  }
  0x62   : > { %237 = sbr.rel (%p1794_p13) target bundleno = 698 (0x2ba), region = 36  ;;  %s239_s5 = sand.u32 (!%p1794_p13), 1, %s1632_s22  }
  0x63   : > { %s1036_s2 = sshll.u32 (!%p1794_p13), %s239_s5, 6  ;;  %s240_s3 = scalar_lea.sflag (!%p1794_p13), [#allocation4], %s239_s5 }
  0x64   : > { %s1896_s24 = scalar_lea.vmem (!%p1794_p13), [#allocation3], %s1036_s2 }
  0x67   : > { %1587 = dma.done.wait (%p1769_p3), %s240_s3, 1024  }
  0x68   : > { %1589 = vsyncadd (%p1769_p3), %s240_s3, 4294966272  ;;  %s2083_s18 = sld [smem:[#allocation18_spill]]  ;;  %s250_s7 = sand.u32 1, %s1620_s19  }
  0x69   : > { %s2084_s9 = sld [smem:[#allocation19_spill]]  ;;  %s1037_s8 = sshll.u32 %s250_s7, 6 }
  0x6a   : > { %s1904_s16 = scalar_lea.vmem [#allocation6], %s1037_s8 }
  0x6e   : > { %s248_s25 = sand.u32 1, %s2083_s18  }
  0x6f   : > { %s249_s10 = scalar_lea.sflag [#allocation7], %s248_s25  ;;  %p2085_p13 = scmp.ne.s32.totalorder %s2084_s9, 0 }
  0x71   : > { %1591 = dma.done.wait (%p2085_p13), %s249_s10, 1024  }
  0x72   : > { %1593 = vsyncadd (%p2085_p13), %s249_s10, 4294966272  ;;  %p2086_p2 = scmp.eq.s32.totalorder %s2083_s18, 0 }
  0x74   : > { %1595 = dma.done.wait (%p2086_p2), [#allocation7], 1024   ;;  %p2087_p10 = pmov %p2086_p2 }
  0x75   : > { %s2088_s6 = sld [smem:[#allocation15_spill]] }
  0x76   : > { %1597 = vsyncadd (%p2087_p10), [#allocation7], 4294966272  ;;  %s2089_s30 = sld [smem:[#allocation16_spill]] }
  0x7b   : > { %s283_s29 = sand.u32 1, %s2088_s6  }
  0x7c   : > { %s1039_s11 = sshll.u32 %s283_s29, 6  ;;  %p1040_p3 = scmp.ne.s32.totalorder %s2089_s30, 0 }
  0x7d   : > { %s1917_s12 = scalar_lea.vmem [#allocation9], %s1039_s11 }
  0x7e   : > { %293 = sbr.rel (%p1040_p3) target bundleno = 140 (0x8c), region = 52 }
  0x83   : > { %v1664_v0 = vmov 0.0  }
  0x84   : > { %294 = vst [vmem:[#allocation2 + $0x30] sm:$0xff] %v1664_v0  ;;  %295 = vst [vmem:[#allocation2] sm:$0xff] %v1664_v0 }
  0x85   : > { %296 = vst [vmem:[#allocation2 + $0x58] sm:$0xff] %v1664_v0  ;;  %297 = vst [vmem:[#allocation2 + $0x18] sm:$0xff] %v1664_v0 }
  0x86   : > { %298 = vst [vmem:[#allocation2 + $0x50] sm:$0xff] %v1664_v0  ;;  %299 = vst [vmem:[#allocation2 + $0x68] sm:$0xff] %v1664_v0 }
  0x87   : > { %300 = vst [vmem:[#allocation2 + $0x8] sm:$0xff] %v1664_v0  ;;  %301 = vst [vmem:[#allocation2 + $0x48] sm:$0xff] %v1664_v0 }
  0x88   : > { %302 = vst [vmem:[#allocation2 + $0x40] sm:$0xff] %v1664_v0  ;;  %303 = vst [vmem:[#allocation2 + $0x20] sm:$0xff] %v1664_v0 }
  0x89   : > { %304 = vst [vmem:[#allocation2 + $0x10] sm:$0xff] %v1664_v0  ;;  %305 = vst [vmem:[#allocation2 + $0x38] sm:$0xff] %v1664_v0 }
  0x8a   : > { %306 = vst [vmem:[#allocation2 + $0x60] sm:$0xff] %v1664_v0  ;;  %307 = vst [vmem:[#allocation2 + $0x70] sm:$0xff] %v1664_v0 }
  0x8b   : > { %308 = vst [vmem:[#allocation2 + $0x78] sm:$0xff] %v1664_v0  ;;  %309 = vst [vmem:[#allocation2 + $0x28] sm:$0xff] %v1664_v0 }
  0x8c PF: > { %v1398_v1 = vld [vmem:[#allocation8 + $0x38] sm:$0xff]   ;;  %v1399_v2 = vld [vmem:[#allocation8 + $0x30] sm:$0xff]   ;;  %v1400_v3 = vld [vmem:[#allocation8 + $0x28] sm:$0xff]   ;;  %s2090_s14 = sld [smem:[#allocation16_spill]] }
  0x8d   : > { %1186 = vmatprep.subr.bf16.mxu0 %v1398_v1  ;;  %v1401_v4 = vld [vmem:[#allocation8 + $0x20] sm:$0xff]   ;;  %v1402_v6 = vld [vmem:[#allocation8 + $0x18] sm:$0xff]   ;;  %v1403_v7 = vld [vmem:[#allocation8 + $0x10] sm:$0xff]  }
  0x8e   : > { %1187 = vmatpush3.bf16.msra.mxu0 %v1398_v1  ;;  %v1406_v5 = vld [vmem:[%s1904_s16] sm:$0xff]   ;;  %v1404_v8 = vld [vmem:[#allocation8 + $0x8] sm:$0xff]   ;;  %v1408_v11 = vld [vmem:[%s1904_s16 + $0x10] sm:$0xff]  }
  0x8f   : > { %1188 = vmatprep.subr.bf16.mxu0 %v1399_v2  ;;  %1202 = vmatprep.mubr.bf16.mxu0 %v1406_v5  ;;  %v1405_v9 = vld [vmem:[#allocation8] sm:$0xff]   ;;  %v1407_v10 = vld [vmem:[%s1904_s16 + $0x8] sm:$0xff]   ;;  %v1409_v12 = vld [vmem:[%s1904_s16 + $0x18] sm:$0xff]  }
  0x90   : > { %v1410_v13 = vld [vmem:[%s1904_s16 + $0x20] sm:$0xff]   ;;  %v1411_v14 = vld [vmem:[%s1904_s16 + $0x28] sm:$0xff]   ;;  %v1412_v15 = vld [vmem:[%s1904_s16 + $0x30] sm:$0xff]  }
  0x91   : > { %v1413_v16 = vld [vmem:[%s1904_s16 + $0x38] sm:$0xff]   ;;  %v1414_v17 = vld [vmem:[%s1896_s24] sm:$0xff]   ;;  %v1415_v42 = vld [vmem:[%s1896_s24 + $0x8] sm:$0xff]  }
  0x92   : > { %1189 = vmatpush3.bf16.msra.mxu0 %v1399_v2  ;;  %1234 = vmatprep.mubr.bf16.mxu1 %v1414_v17  ;;  %v1416_v43 = vld [vmem:[%s1896_s24 + $0x10] sm:$0xff]   ;;  %v1417_v44 = vld [vmem:[%s1896_s24 + $0x18] sm:$0xff]   ;;  %v1418_v45 = vld [vmem:[%s1896_s24 + $0x20] sm:$0xff]   ;;  %p1065_p1 = scmp.ne.s32.totalorder %s2090_s14, 1 }
  0x93   : > { %1190 = vmatprep.subr.bf16.mxu0 %v1400_v3  ;;  %v1419_v46 = vld [vmem:[%s1896_s24 + $0x28] sm:$0xff]   ;;  %v1420_v47 = vld [vmem:[%s1896_s24 + $0x30] sm:$0xff]   ;;  %v1421_v48 = vld [vmem:[%s1896_s24 + $0x38] sm:$0xff]   ;;  %s2091_s3 = sld [smem:[#allocation24_spill]] (!%p1065_p1) }
  0x94   : > { %v537_v49 = vld [vmem:[#allocation2 + $0x58] sm:$0xff]  ;;  %v535_v51 = vld [vmem:[#allocation2 + $0x30] sm:$0xff]  ;;  %v536_v57 = vld [vmem:[#allocation2] sm:$0xff] }
  0x95   : > { %v538_v54 = vld [vmem:[#allocation2 + $0x18] sm:$0xff]  ;;  %v541_v60 = vld [vmem:[#allocation2 + $0x8] sm:$0xff]  ;;  %v539_v63 = vld [vmem:[#allocation2 + $0x50] sm:$0xff] }
  0x96   : > { %1191 = vmatpush3.bf16.msra.mxu0 %v1400_v3  ;;  %v542_v2 = vld [vmem:[#allocation2 + $0x48] sm:$0xff]  ;;  %v544_v17 = vld [vmem:[#allocation2 + $0x20] sm:$0xff] }
  0x97   : > { %1192 = vmatprep.subr.bf16.mxu0 %v1401_v4  ;;  %v540_v5 = vld [vmem:[#allocation2 + $0x68] sm:$0xff] }
  0x9a   : > { %1193 = vmatpush3.bf16.msra.mxu0 %v1401_v4 }
  0x9b   : > { %1194 = vmatprep.subr.bf16.mxu0 %v1402_v6 }
  0x9e   : > { %1195 = vmatpush3.bf16.msra.mxu0 %v1402_v6 }
  0x9f   : > { %1196 = vmatprep.subr.bf16.mxu0 %v1403_v7 }
  0xa2   : > { %1197 = vmatpush3.bf16.msra.mxu0 %v1403_v7 }
  0xa3   : > { %1198 = vmatprep.subr.bf16.mxu0 %v1404_v8 }
  0xa6   : > { %1199 = vmatpush3.bf16.msra.mxu0 %v1404_v8  ;;  %v545_v8 = vld [vmem:[#allocation2 + $0x10] sm:$0xff] }
  0xa7   : > { %1200 = vmatprep.subr.bf16.mxu0 %v1405_v9 }
  0xaa   : > { %1201 = vmatpush3.bf16.msra.mxu0 %v1405_v9 }
  0xad   : > { %1203 = vmatmul.mubr.bf16.vlgmr.msra.gmra.mxu0 %v1407_v10 }
  0xae   : > { %1206 = vmatprep.mubr.bf16.mxu0 %v1408_v11  ;;  %v543_v11 = vld [vmem:[#allocation2 + $0x40] sm:$0xff] }
  0xb5   : > { %1207 = vmatmul.mubr.bf16.gmra.mxu0 %v1409_v12 }
  0xb6   : > { %1210 = vmatprep.mubr.bf16.mxu0 %v1410_v13 }
  0xbd   : > { %1211 = vmatmul.mubr.bf16.gmra.mxu0 %v1411_v14  ;;  %v546_v14 = vld [vmem:[#allocation2 + $0x38] sm:$0xff] }
  0xbe   : > { %1214 = vmatprep.mubr.bf16.mxu0 %v1412_v15 }
  0xc5   : > { %1215 = vmatmul.mubr.bf16.gmra.mxu0 %v1413_v16 }
 0x16d   : > { %v1204_v18 = vpop.f32.mrf.mxu0 }
 0x16f   : > { %v472_v19 = vpop.f32.mrf.mxu0 }
 0x171   : > { %v1205_v20 = vpop.f32.mrf.mxu0 }
 0x172   : > { %v568_v40 = vpack.c.bf16 %v1205_v20, %v1204_v18  ;;  %v549_v20 = vld [vmem:[#allocation2 + $0x78] sm:$0xff] }
 0x173   : > { %v475_v21 = vpop.f32.mrf.mxu0 }
 0x174   : > { %v567_v41 = vpack.c.bf16 %v475_v21, %v472_v19 }
 0x175   : > { %v1208_v22 = vpop.f32.mrf.mxu0 }
 0x177   : > { %v488_v23 = vpop.f32.mrf.mxu0 }
 0x179   : > { %v1209_v24 = vpop.f32.mrf.mxu0 }
 0x17a   : > { %v570_v38 = vpack.c.bf16 %v1209_v24, %v1208_v22 }
 0x17b   : > { %v491_v25 = vpop.f32.mrf.mxu0 }
 0x17c   : > { %v569_v39 = vpack.c.bf16 %v491_v25, %v488_v23  ;;  %v547_v23 = vld [vmem:[#allocation2 + $0x60] sm:$0xff] }
 0x17d   : > { %v1212_v26 = vpop.f32.mrf.mxu0 }
 0x17f   : > { %v504_v27 = vpop.f32.mrf.mxu0 }
 0x181   : > { %v1213_v28 = vpop.f32.mrf.mxu0 }
 0x182   : > { %v572_v36 = vpack.c.bf16 %v1213_v28, %v1212_v26  ;;  %v550_v26 = vld [vmem:[#allocation2 + $0x28] sm:$0xff] }
 0x183   : > { %v507_v29 = vpop.f32.mrf.mxu0 }
 0x184   : > { %v571_v37 = vpack.c.bf16 %v507_v29, %v504_v27  ;;  %v548_v29 = vld [vmem:[#allocation2 + $0x70] sm:$0xff] }
 0x185   : > { %v1216_v30 = vpop.f32.mrf.mxu0 }
 0x187   : > { %v520_v31 = vpop.f32.mrf.mxu0 }
 0x189   : > { %v1217_v32 = vpop.f32.mrf.mxu0 }
 0x18a   : > { %v574_v33 = vpack.c.bf16 %v1217_v32, %v1216_v30 }
 0x18b   : > { %v523_v34 = vpop.f32.mrf.mxu0 }
 0x18c   : > { %v573_v35 = vpack.c.bf16 %v523_v34, %v520_v31  ;;  %1218 = vmatprep.subr.bf16.mxu1 %v574_v33 }
 0x18d   : > { %1219 = vmatpush3.bf16.msra.mxu1 %v574_v33 }
 0x18e   : > { %1220 = vmatprep.subr.bf16.mxu1 %v573_v35 }
 0x191   : > { %1221 = vmatpush3.bf16.msra.mxu1 %v573_v35 }
 0x192   : > { %1222 = vmatprep.subr.bf16.mxu1 %v572_v36 }
 0x195   : > { %1223 = vmatpush3.bf16.msra.mxu1 %v572_v36 }
 0x196   : > { %1224 = vmatprep.subr.bf16.mxu1 %v571_v37 }
 0x199   : > { %1225 = vmatpush3.bf16.msra.mxu1 %v571_v37 }
 0x19a   : > { %1226 = vmatprep.subr.bf16.mxu1 %v570_v38 }
 0x19d   : > { %1227 = vmatpush3.bf16.msra.mxu1 %v570_v38 }
 0x19e   : > { %1228 = vmatprep.subr.bf16.mxu1 %v569_v39 }
 0x1a1   : > { %1229 = vmatpush3.bf16.msra.mxu1 %v569_v39 }
 0x1a2   : > { %1230 = vmatprep.subr.bf16.mxu1 %v568_v40 }
 0x1a5   : > { %1231 = vmatpush3.bf16.msra.mxu1 %v568_v40 }
 0x1a6   : > { %1232 = vmatprep.subr.bf16.mxu1 %v567_v41 }
 0x1a9   : > { %1233 = vmatpush3.bf16.msra.mxu1 %v567_v41 }
 0x1ac   : > { %1235 = vmatmul.mubr.bf16.vlgmr.msra.gmra.mxu1 %v1415_v42 }
 0x1ad   : > { %1238 = vmatprep.mubr.bf16.mxu1 %v1416_v43 }
 0x1b4   : > { %1239 = vmatmul.mubr.bf16.gmra.mxu1 %v1417_v44 }
 0x1b5   : > { %1242 = vmatprep.mubr.bf16.mxu1 %v1418_v45 }
 0x1bc   : > { %1243 = vmatmul.mubr.bf16.gmra.mxu1 %v1419_v46 }
 0x1bd   : > { %1246 = vmatprep.mubr.bf16.mxu1 %v1420_v47 }
 0x1c4   : > { %1247 = vmatmul.mubr.bf16.gmra.mxu1 %v1421_v48 }
 0x26c   : > { %v1236_v50 = vpop.f32.mrf.mxu1 }
 0x26d   : > { %v722_v52 = vadd.f32 %v1236_v50, %v537_v49 }
 0x26e   : > { %v657_v53 = vpop.f32.mrf.mxu1 }
 0x26f   : > { %738 = vst [vmem:[#allocation2 + $0x58] sm:$0xff] %v722_v52  ;;  %v720_v55 = vadd.f32 %v657_v53, %v535_v51 }
 0x270   : > { %v1237_v56 = vpop.f32.mrf.mxu1 }
 0x271   : > { %736 = vst [vmem:[#allocation2 + $0x30] sm:$0xff] %v720_v55  ;;  %v723_v58 = vadd.f32 %v1237_v56, %v538_v54 }
 0x272   : > { %v660_v59 = vpop.f32.mrf.mxu1 }
 0x273   : > { %739 = vst [vmem:[#allocation2 + $0x18] sm:$0xff] %v723_v58  ;;  %v721_v61 = vadd.f32 %v660_v59, %v536_v57 }
 0x274   : > { %v1240_v62 = vpop.f32.mrf.mxu1 }
 0x275   : > { %737 = vst [vmem:[#allocation2] sm:$0xff] %v721_v61  ;;  %v726_v0 = vadd.f32 %v1240_v62, %v541_v60 }
 0x276   : > { %v673_v1 = vpop.f32.mrf.mxu1 }
 0x277   : > { %742 = vst [vmem:[#allocation2 + $0x8] sm:$0xff] %v726_v0  ;;  %v724_v3 = vadd.f32 %v673_v1, %v539_v63 }
 0x278   : > { %v1241_v4 = vpop.f32.mrf.mxu1 }
 0x279   : > { %740 = vst [vmem:[#allocation2 + $0x50] sm:$0xff] %v724_v3  ;;  %v727_v6 = vadd.f32 %v1241_v4, %v542_v2 }
 0x27a   : > { %v676_v7 = vpop.f32.mrf.mxu1 }
 0x27b   : > { %743 = vst [vmem:[#allocation2 + $0x48] sm:$0xff] %v727_v6  ;;  %v725_v9 = vadd.f32 %v676_v7, %v540_v5 }
 0x27c   : > { %v1244_v10 = vpop.f32.mrf.mxu1 }
 0x27d   : > { %741 = vst [vmem:[#allocation2 + $0x68] sm:$0xff] %v725_v9  ;;  %v730_v12 = vadd.f32 %v1244_v10, %v545_v8 }
 0x27e   : > { %v689_v13 = vpop.f32.mrf.mxu1 }
 0x27f   : > { %746 = vst [vmem:[#allocation2 + $0x10] sm:$0xff] %v730_v12  ;;  %v728_v15 = vadd.f32 %v689_v13, %v543_v11 }
 0x280   : > { %v1245_v16 = vpop.f32.mrf.mxu1 }
 0x281   : > { %744 = vst [vmem:[#allocation2 + $0x40] sm:$0xff] %v728_v15  ;;  %v731_v18 = vadd.f32 %v1245_v16, %v546_v14 }
 0x282   : > { %v692_v19 = vpop.f32.mrf.mxu1 }
 0x283   : > { %747 = vst [vmem:[#allocation2 + $0x38] sm:$0xff] %v731_v18  ;;  %v729_v21 = vadd.f32 %v692_v19, %v544_v17 }
 0x284   : > { %v1248_v22 = vpop.f32.mrf.mxu1 }
 0x285   : > { %745 = vst [vmem:[#allocation2 + $0x20] sm:$0xff] %v729_v21  ;;  %v734_v24 = vadd.f32 %v1248_v22, %v549_v20 }
 0x286   : > { %v705_v25 = vpop.f32.mrf.mxu1 }
 0x287   : > { %750 = vst [vmem:[#allocation2 + $0x78] sm:$0xff] %v734_v24  ;;  %v732_v27 = vadd.f32 %v705_v25, %v547_v23 }
 0x288   : > { %v1249_v28 = vpop.f32.mrf.mxu1 }
 0x289   : > { %748 = vst [vmem:[#allocation2 + $0x60] sm:$0xff] %v732_v27  ;;  %v735_v30 = vadd.f32 %v1249_v28, %v550_v26  ;;  %755 = sbr.rel (%p1065_p1) target bundleno = 670 (0x29e), region = 56 }
 0x28a   : > { %v708_v31 = vpop.f32.mrf.mxu1 }
 0x28b   : > { %751 = vst [vmem:[#allocation2 + $0x28] sm:$0xff] %v735_v30  ;;  %v733_v32 = vadd.f32 %v708_v31, %v548_v29 }
 0x28d   : > { %749 = vst [vmem:[#allocation2 + $0x70] sm:$0xff] %v733_v32 }
 0x28e   : > { %v756_v33 = vld [vmem:[#allocation2 + $0x30] sm:$0xff]  ;;  %v757_v34 = vld [vmem:[#allocation2] sm:$0xff]  ;;  %v758_v38 = vld [vmem:[#allocation2 + $0x58] sm:$0xff] }
 0x28f   : > { %v1066_v35 = vld [vmem:[%s2091_s3] ss:$0 sm:$0xff]  ;;  %v759_v39 = vld [vmem:[#allocation2 + $0x18] sm:$0xff]  ;;  %v760_v40 = vld [vmem:[#allocation2 + $0x50] sm:$0xff] }
 0x290   : > { %v779_v36 = vadd.f32 %v1066_v35, %v756_v33  ;;  %v780_v37 = vadd.f32 %v1066_v35, %v757_v34  ;;  %v781_v41 = vadd.f32 %v1066_v35, %v758_v38  ;;  %v782_v42 = vadd.f32 %v1066_v35, %v759_v39  ;;  %v761_v43 = vld [vmem:[#allocation2 + $0x68] sm:$0xff]  ;;  %v764_v51 = vld [vmem:[#allocation2 + $0x40] sm:$0xff]  ;;  %v766_v53 = vld [vmem:[#allocation2 + $0x10] sm:$0xff] }
 0x291   : > { %v783_v44 = vadd.f32 %v1066_v35, %v760_v40  ;;  %v762_v45 = vld [vmem:[#allocation2 + $0x8] sm:$0xff]  ;;  %v784_v49 = vadd.f32 %v1066_v35, %v761_v43  ;;  %v765_v52 = vld [vmem:[#allocation2 + $0x20] sm:$0xff]  ;;  %v767_v58 = vld [vmem:[#allocation2 + $0x38] sm:$0xff]  ;;  %v787_v63 = vadd.f32 %v1066_v35, %v764_v51  ;;  %v789_v4 = vadd.f32 %v1066_v35, %v766_v53 }
 0x292   : > { %v763_v46 = vld [vmem:[#allocation2 + $0x48] sm:$0xff]  ;;  %v795_v47 = vmax.f32 %v779_v36, 0.0  ;;  %v796_v48 = vmax.f32 %v780_v37, 0.0  ;;  %v785_v50 = vadd.f32 %v1066_v35, %v762_v45  ;;  %v797_v54 = vmax.f32 %v781_v41, 0.0  ;;  %v768_v59 = vld [vmem:[#allocation2 + $0x60] sm:$0xff]  ;;  %v770_v5 = vld [vmem:[#allocation2 + $0x78] sm:$0xff] }
 0x293   : > { %v798_v55 = vmax.f32 %v782_v42, 0.0  ;;  %v799_v56 = vmax.f32 %v783_v44, 0.0  ;;  %v786_v57 = vadd.f32 %v1066_v35, %v763_v46  ;;  %v800_v61 = vmax.f32 %v784_v49, 0.0  ;;  %v771_v6 = vld [vmem:[#allocation2 + $0x28] sm:$0xff] }
 0x294   : > { %v1110_v60 = vpack.c.bf16 %v796_v48, %v795_v47  ;;  %v801_v62 = vmax.f32 %v785_v50, 0.0  ;;  %v769_v0 = vld [vmem:[#allocation2 + $0x70] sm:$0xff]  ;;  %v788_v3 = vadd.f32 %v1066_v35, %v765_v52  ;;  %v803_v8 = vmax.f32 %v787_v63, 0.0 }
 0x295   : > { %v1115_v1 = vpack.c.bf16 %v798_v55, %v797_v54  ;;  %v802_v2 = vmax.f32 %v786_v57, 0.0  ;;  %v1120_v7 = vpack.c.bf16 %v800_v61, %v799_v56  ;;  %v790_v9 = vadd.f32 %v1066_v35, %v767_v58 }
 0x296   : > { %1111 = vst [vmem:[%s1917_s12] sm:$0xff] %v1110_v60   ;;  %v791_v10 = vadd.f32 %v1066_v35, %v768_v59  ;;  %v804_v12 = vmax.f32 %v788_v3, 0.0  ;;  %v805_v13 = vmax.f32 %v789_v4, 0.0  ;;  %v792_v14 = vadd.f32 %v1066_v35, %v769_v0 }
 0x297   : > { %1147 = vst [vmem:[%s1917_s12 + $0x8] sm:$0xff] %v1115_v1   ;;  %v1125_v11 = vpack.c.bf16 %v802_v2, %v801_v62  ;;  %1148 = vst [vmem:[%s1917_s12 + $0x10] sm:$0xff] %v1120_v7   ;;  %v806_v15 = vmax.f32 %v790_v9, 0.0  ;;  %v793_v17 = vadd.f32 %v1066_v35, %v770_v5  ;;  %v794_v18 = vadd.f32 %v1066_v35, %v771_v6 }
 0x298   : > { %v807_v16 = vmax.f32 %v791_v10, 0.0  ;;  %v1130_v19 = vpack.c.bf16 %v804_v12, %v803_v8  ;;  %v808_v20 = vmax.f32 %v792_v14, 0.0 }
 0x299   : > { %1149 = vst [vmem:[%s1917_s12 + $0x18] sm:$0xff] %v1125_v11   ;;  %v1135_v21 = vpack.c.bf16 %v806_v15, %v805_v13  ;;  %v809_v22 = vmax.f32 %v793_v17, 0.0  ;;  %v810_v23 = vmax.f32 %v794_v18, 0.0 }
 0x29a   : > { %1150 = vst [vmem:[%s1917_s12 + $0x20] sm:$0xff] %v1130_v19   ;;  %v1140_v24 = vpack.c.bf16 %v808_v20, %v807_v16 }
 0x29b   : > { %1151 = vst [vmem:[%s1917_s12 + $0x28] sm:$0xff] %v1135_v21   ;;  %v1145_v25 = vpack.c.bf16 %v810_v23, %v809_v22 }
 0x29c   : > { %1152 = vst [vmem:[%s1917_s12 + $0x30] sm:$0xff] %v1140_v24  }
 0x29d   : > { %1153 = vst [vmem:[%s1917_s12 + $0x38] sm:$0xff] %v1145_v25  }
 0x29e PF: > { %s2092_s24 = sld [smem:[#allocation17_spill]]  ;;  %s905_s6 = sshll.u32 %s1917_s12, 4  ;;  %s1955_s6 = int_to_ptr.vmem [resolvable:$true] %s905_s6 }
 0x29f   : > { %s2094_s9 = sld [smem:[#allocation20_spill]]  ;;  %s1959_s11 = scalar_lea.sflag [#allocation5], %s283_s29 }
 0x2a0   : > { %s2095_s10 = sld [smem:[#allocation25_spill]]  ;;  %s1504_s30 = scalar_lea.vmem %s1955_s6, 1024 }
 0x2a1   : > { %p1505_p5 = scmp.ne.s32.totalorder %s1955_s6, %s1504_s30  ;;  %s1665_s14 = smov [#allocation9]  }
 0x2a2   : > { %s1508_s5 = sshll.u32 %s1665_s14, 4  ;;  %s1509_s5 = int_to_ptr.vmem [resolvable:$false] %s1508_s5 }
 0x2a3   : > { %s1510_s2 = scalar_lea.vmem %s1509_s5, 2048  ;;  %p1511_p9 = scmp.lt.s32.totalorder %s1955_s6, %s1509_s5 }
 0x2a4   : > { %s1106_s25 = sshll.u32 %s2092_s24, 10  ;;  %p1512_p4 = scmp.lt.s32.totalorder %s1510_s2, %s1504_s30 }
 0x2a5   : > { %p2096_p11 = scmp.ne.s32.totalorder %s2094_s9, 0 }
 0x2a6   : > { %s1952_s16 = scalar_lea.hbm %s2095_s10, %s1106_s25  ;;  %p1513_p12 = por %p1512_p4, %p1511_p9 }
 0x2a7   : > { %p1506_p0 = pnand %p1505_p5, %p2096_p11 }
 0x2a9   : > { %p1507_p8 = pneg %p1506_p0 }
 0x2ab   : > { %p1514_p6 = pnand %p1513_p12, %p1507_p8 }
 0x2ad   : > { %1517 = shalt.err (!%p1514_p6)
}
 0x2ae   : > { %s1518_s29 = scalar_lea.hbm %s1952_s16, 1024  ;;  %s1522_s24 = scalar_lea.hbm %s2095_s10, 2048 }
 0x2af   : > { %p1519_p7 = scmp.ne.s32.totalorder %s1952_s16, %s1518_s29  ;;  %p1523_p10 = scmp.lt.s32.totalorder %s1952_s16, %s2095_s10 }
 0x2b0   : > { %p1524_p3 = scmp.lt.s32.totalorder %s1522_s24, %s1518_s29 }
 0x2b1   : > { %p1520_p13 = pnand %p1519_p7, %p2096_p11 }
 0x2b2   : > { %p1525_p1 = por %p1524_p3, %p1523_p10 }
 0x2b3   : > { %p1521_p2 = pneg %p1520_p13 }
 0x2b5   : > { %p1526_p5 = pnand %p1525_p1, %p1521_p2 }
 0x2b7   : > { %1529 = shalt.err (!%p1526_p5)
}
 0x2b8   : > { %s1666_s7 = smov 64   ;;  %s1667_s8 = smov 4  }
 0x2b9   : > { %1258 = dma.vmem_to_hbm [thread:$0]  (%p2096_p11), %s1955_s6, 1024, %s1952_s16, %s1959_s11, %s1666_s7, %s1666_s7, %s1667_s8  }
 0x2ba PF: > { %s2097_s30 = sld [smem:[#allocation14_spill]]  ;;  %p1278_p0 = scmp.ge.s32.totalorder %s1656_s28, 2 }
 0x2bb   : > { %s2098_s14 = sld [smem:[#allocation21_spill]] }
 0x2c0   : > { %s920_s5 = sand.u32 1, %s2097_s30  }
 0x2c1   : > { %p2099_p8 = scmp.ne.s32.totalorder %s2098_s14, 0  ;;  %s921_s2 = scalar_lea.sflag [#allocation5], %s920_s5 }
 0x2c3   : > { %p1272_p9 = pnand %p1278_p0, %p2099_p8 }
 0x2c5   : > { %p1273_p4 = pneg %p1272_p9 }
 0x2c7   : > { %1599 = dma.done.wait (%p1273_p4), %s921_s2, 1024  }
 0x2c8   : > { %1601 = vsyncadd (%p1273_p4), %s921_s2, 4294966272  ;;  %s23_s28 = sadd.s32 1, %s1656_s28   ;;  %s2101_s9 = sld [smem:[#allocation15_spill]] }
 0x2c9   : > { %p1987_p12 = scmp.ge.s32.totalorder %s23_s28, 6   ;;  %s2102_s6 = smov %s1839_s15 }
 0x2ca   : > { %s2103_s11 = sld [smem:[#allocation22_spill]]  ;;  %s2105_s16 = smov %s1612_s17 }
 0x2cb   : > { %s2106_s17 = smov %s2102_s6  ;;  %s2107_s18 = smov %s1620_s19 }
 0x2cc   : > { %s2108_s19 = smov %s1624_s20  ;;  %s2109_s20 = smov %s1869_s21 }
 0x2cd   : > { %s2110_s21 = smov %s1632_s22  ;;  %s2111_s22 = smov %s1636_s23 }
 0x2ce   : > { %s2104_s15 = smov %s2101_s9  ;;  %s2112_s23 = smov %s1842_s4 }
 0x2cf   : > { %s2113_s24 = smov %s1648_s26  ;;  %s2114_s25 = smov %s1652_s27 }
 0x2d0   : > { %s2115_s26 = smov %s2103_s11  ;;  %s2116_s27 = smov %s2122_s13 }
 0x2d1   :  { %22 = sbr.rel (!%p1987_p12) target bundleno = 16 (0x10), region = 106 }
 0x2d6   :  { %926 = vsyncpa [#allocation4], 1 }
 0x2d7   :  { %928 = vsyncpa [#allocation4 + $0x1], 1 }
 0x2d8   :  { %929 = vsyncpa [#allocation7], 1 }
 0x2d9   :  { %931 = vsyncpa [#allocation7 + $0x1], 1 }
 0x2da   :  { %932 = vsyncpa [#allocation5], 1 }
 0x2db   :  { %934 = vsyncpa [#allocation5 + $0x1], 1 }

</bundles_post_ra>
